<compile_context>
chip_gen: v6e
topology: v6e:2x2x1
jax: 0.10.0
libtpu: 0.0.40
codegen_flags: <defaults>
</compile_context>

<pallas_src>
import jax
import jax.numpy as jnp
from jax.experimental import pallas as pl
from jax.experimental.pallas import tpu as pltpu


# ----------------------------- Pallas kernels ------------------------------

def _fuse_kernel(mag_ref, pha_ref,
                 wa1_ref, ba1_ref, wa2_ref, ba2_ref,
                 wp1_ref, bp1_ref, wp2_ref, bp2_ref,
                 real_ref, imag_ref):
    # mag/pha tiles: (N*C, T) lane-dense, sublane-dense blocks.
    m = mag_ref[...]
    p = pha_ref[...]

    hm = jnp.dot(wa1_ref[...], m, preferred_element_type=jnp.float32) + ba1_ref[...]
    hm = jnp.maximum(hm, 0.1 * hm)                       # LeakyReLU(0.1)
    mo = jnp.dot(wa2_ref[...], hm, preferred_element_type=jnp.float32) + ba2_ref[...]

    hp = jnp.dot(wp1_ref[...], p, preferred_element_type=jnp.float32) + bp1_ref[...]
    hp = jnp.maximum(hp, 0.1 * hp)                       # LeakyReLU(0.1)
    po = jnp.dot(wp2_ref[...], hp, preferred_element_type=jnp.float32) + bp2_ref[...]

    # modulation (commutes with the later 2x nearest replication)
    real_ref[...] = mo * jnp.cos(po)
    imag_ref[...] = mo * jnp.sin(po)


def _post_kernel(x_ref, w_ref, b_ref, o_ref):
    # 1x1 conv as one MXU contraction: (N*C, N*C) @ (N*C, T) + (N*C, 1)
    o_ref[...] = (jnp.dot(w_ref[...], x_ref[...],
                          preferred_element_type=jnp.float32) + b_ref[...])


# ----------------------------- tiling helpers --------------------------------

def _num_tensorcores():
    """2 on v7x-class chips (2 TensorCores / chip), else 1.  Perf-only heuristic."""
    try:
        kind = jax.devices()[0].device_kind.lower()
    except Exception:
        return 1
    return 2 if ("v7" in kind or "7x" in kind) else 1


def _lane_tile(total, rows, block_bytes=1 << 20, num_tc=1):
    """Largest lane tile T (multiple of 128) that divides `total` and keeps a
    (rows, T) f32 block under `block_bytes`.  On 2-TC chips prefer a T giving
    an even grid length so both TensorCores get equal work."""
    if total % 128 != 0:
        return total                        # single full-extent block fallback
    cap = max(128, (block_bytes // (rows * 4)) // 128 * 128)

    def best(pred):
        t = min(cap, total)
        t -= t % 128
        while t >= 128:
            if total % t == 0 and pred(total // t):
                return t
            t -= 128
        return None

    if num_tc >= 2:
        t = best(lambda g: g % num_tc == 0)
        if t is not None:
            return t
    t = best(lambda g: True)
    return t if t is not None else total


_COMPILER_PARAMS = pltpu.CompilerParams(
    dimension_semantics=("parallel",),
    vmem_limit_bytes=32 * 1024 * 1024,      # safe on v5e/v6e/v7x (<= 64 MiB phys)
)


# ----------------------------- Pallas wrappers ------------------------------

def _fuse_pallas(mag, pha, wa1, ba1, wa2, ba2, wp1, bp1, wp2, bp2, num_tc):
    # mag, pha: (R, P) with R = N*C.  Returns (real, imag), each (R, P).
    R, P = mag.shape
    pad = (-P) % 128
    if pad:                                  # robustness path (P not a 128-multiple)
        mag = jnp.pad(mag, ((0, 0), (0, pad)))
        pha = jnp.pad(pha, ((0, 0), (0, pad)))
    Pp = P + pad
    T = _lane_tile(Pp, R, num_tc=num_tc)

    data_spec = pl.BlockSpec((R, T), lambda i: (0, i))
    w_spec = pl.BlockSpec((R, R), lambda i: (0, 0))
    b_spec = pl.BlockSpec((R, 1), lambda i: (0, 0))

    real, imag = pl.pallas_call(
        _fuse_kernel,
        grid=(Pp // T,),
        in_specs=[data_spec, data_spec,
                  w_spec, b_spec, w_spec, b_spec,
                  w_spec, b_spec, w_spec, b_spec],
        out_specs=(data_spec, data_spec),
        out_shape=(jax.ShapeDtypeStruct((R, Pp), jnp.float32),
                   jax.ShapeDtypeStruct((R, Pp), jnp.float32)),
        compiler_params=_COMPILER_PARAMS,
    )(mag, pha, wa1, ba1, wa2, ba2, wp1, bp1, wp2, bp2)

    if pad:
        real = real[:, :P]
        imag = imag[:, :P]
    return real, imag


def _post_pallas(x, w, b, num_tc):
    # x: (R, P) -> (R, P), R = N*C (sublane-dense), w: (R, R), b: (R, 1)
    R, P = x.shape
    pad = (-P) % 128
    if pad:
        x = jnp.pad(x, ((0, 0), (0, pad)))
    Pp = P + pad
    T = _lane_tile(Pp, R, num_tc=num_tc)

    data_spec = pl.BlockSpec((R, T), lambda i: (0, i))
    w_spec = pl.BlockSpec((R, R), lambda i: (0, 0))
    b_spec = pl.BlockSpec((R, 1), lambda i: (0, 0))

    y = pl.pallas_call(
        _post_kernel,
        grid=(Pp // T,),
        in_specs=[data_spec, w_spec, b_spec],
        out_specs=data_spec,
        out_shape=jax.ShapeDtypeStruct((R, Pp), jnp.float32),
        compiler_params=_COMPILER_PARAMS,
    )(x, w, b)

    if pad:
        y = y[:, :P]
    return y


# ----------------------------- Module forward -------------------------------

def init_params(key, channels):
    ks = jax.random.split(key, 10)

    def conv(kw, kb):
        w = jax.random.normal(kw, (channels, channels), jnp.float32) * 0.1
        b = jax.random.normal(kb, (channels,), jnp.float32) * 0.1
        return w, b.reshape(channels, 1)

    wa1, ba1 = conv(ks[0], ks[1])
    wa2, ba2 = conv(ks[2], ks[3])
    wp1, bp1 = conv(ks[4], ks[5])
    wp2, bp2 = conv(ks[6], ks[7])
    wpost, bpost = conv(ks[8], ks[9])
    return dict(wa1=wa1, ba1=ba1, wa2=wa2, ba2=ba2,
                wp1=wp1, bp1=bp1, wp2=wp2, bp2=bp2,
                wpost=wpost, bpost=bpost)


def freup_areadinterpolation(x, params, *, num_tc=None):
    N, C, H, W = x.shape
    P = H * W
    R = N * C
    if num_tc is None:
        num_tc = _num_tensorcores()

    # FFT, magnitude, phase (XLA).  (N,C,H,W) -> (N*C, H*W) is a pure reshape.
    fft_x = jnp.fft.fft2(x)
    mag = jnp.abs(fft_x).astype(jnp.float32).reshape(R, P)
    pha = jnp.angle(fft_x).astype(jnp.float32).reshape(R, P)

    # Replicate the per-channel 1x1-conv weights block-diagonally over the batch
    # (kron(I_N, W)), so the batch can live on the sublane axis.  Tiny arrays.
    eye = jnp.eye(N, dtype=jnp.float32)
    rep_w = lambda w: jnp.kron(eye, w)                 # (R, R)
    rep_b = lambda b: jnp.tile(b, (N, 1))              # (R, 1)

    real, imag = _fuse_pallas(
        mag, pha,
        rep_w(params["wa1"]), rep_b(params["ba1"]),
        rep_w(params["wa2"]), rep_b(params["ba2"]),
        rep_w(params["wp1"]), rep_b(params["bp1"]),
        rep_w(params["wp2"]), rep_b(params["bp2"]),
        num_tc)

    real = real.reshape(N, C, H, W)
    imag = imag.reshape(N, C, H, W)

    # repeat_interleave(2, dim=2/3); cos/sin modulation already applied (commutes
    # exactly with nearest replication).
    real_up = jnp.repeat(jnp.repeat(real, 2, axis=2), 2, axis=3)
    imag_up = jnp.repeat(jnp.repeat(imag, 2, axis=2), 2, axis=3)

    output = jnp.abs(jnp.fft.ifft2(jax.lax.complex(real_up, imag_up)))
    output = output.astype(jnp.float32)                # (N, C, 2H, 2W)

    # quadrant crop (pure slicing glue, matches the reference indices)
    h2, w2 = H // 2, W // 2
    top = jnp.concatenate(
        [output[:, :, 0:h2, 0:w2], output[:, :, 0:h2, 3 * w2:4 * w2]], axis=3)
    bot = jnp.concatenate(
        [output[:, :, 3 * h2:4 * h2, 0:w2],
         output[:, :, 3 * h2:4 * h2, 3 * w2:4 * w2]], axis=3)
    crop = jnp.concatenate([top, bot], axis=2)         # (N, C, H, W)

    # post 1x1 conv BEFORE the 2x nearest upsample (exact, 4x less kernel traffic)
    y = _post_pallas(crop.reshape(R, P),
                     rep_w(params["wpost"]), rep_b(params["bpost"]), num_tc)
    y = y.reshape(N, C, H, W)

    # F.interpolate(..., (2H, 2W)) default mode='nearest' == 2x replication
    return jnp.repeat(jnp.repeat(y, 2, axis=2), 2, axis=3)   # (N, C, 2H, 2W)


# --------------------------------- Driver ------------------------------------

if __name__ == "__main__":
    key = jax.random.PRNGKey(0)
    kx, kp = jax.random.split(key)

    N, C, H, W = 2, 4, 16, 16
    x = jax.random.normal(kx, (N, C, H, W), jnp.float32)
    params = init_params(kp, C)

    out = jax.jit(freup_areadinterpolation)(x, params)
    out = jax.block_until_ready(out)

    assert out.shape == (N, C, 2 * H, 2 * W)
    assert out.dtype == jnp.float32
    print("KERNEL_OK")
</pallas_src>

<mosaic_0001>
module attributes {stable_mosaic.version = 11 : i64} {
  func.func @_fuse_kernel(%arg0: i32, %arg1: memref<8x256xf32, #tpu.memory_space<vmem>>, %arg2: memref<8x256xf32, #tpu.memory_space<vmem>>, %arg3: memref<8x8xf32, #tpu.memory_space<vmem>>, %arg4: memref<8x1xf32, #tpu.memory_space<vmem>>, %arg5: memref<8x8xf32, #tpu.memory_space<vmem>>, %arg6: memref<8x1xf32, #tpu.memory_space<vmem>>, %arg7: memref<8x8xf32, #tpu.memory_space<vmem>>, %arg8: memref<8x1xf32, #tpu.memory_space<vmem>>, %arg9: memref<8x8xf32, #tpu.memory_space<vmem>>, %arg10: memref<8x1xf32, #tpu.memory_space<vmem>>, %arg11: memref<8x256xf32, #tpu.memory_space<vmem>>, %arg12: memref<8x256xf32, #tpu.memory_space<vmem>>) attributes {dimension_semantics = [#tpu.dimension_semantics<parallel>], iteration_bounds = array<i64: 1>, scalar_prefetch = 0 : i64, scratch_operands = 0 : i64, tpu.core_type = #tpu.core_type<tc>, window_params = [{transform_indices = @transform_0, window_bounds = array<i64: 8, 256>}, {transform_indices = @transform_1, window_bounds = array<i64: 8, 256>}, {pipeline_mode = #tpu.pipeline_mode<synchronous>, transform_indices = @transform_2, window_bounds = array<i64: 8, 8>}, {pipeline_mode = #tpu.pipeline_mode<synchronous>, transform_indices = @transform_3, window_bounds = array<i64: 8, 1>}, {pipeline_mode = #tpu.pipeline_mode<synchronous>, transform_indices = @transform_4, window_bounds = array<i64: 8, 8>}, {pipeline_mode = #tpu.pipeline_mode<synchronous>, transform_indices = @transform_5, window_bounds = array<i64: 8, 1>}, {pipeline_mode = #tpu.pipeline_mode<synchronous>, transform_indices = @transform_6, window_bounds = array<i64: 8, 8>}, {pipeline_mode = #tpu.pipeline_mode<synchronous>, transform_indices = @transform_7, window_bounds = array<i64: 8, 1>}, {pipeline_mode = #tpu.pipeline_mode<synchronous>, transform_indices = @transform_8, window_bounds = array<i64: 8, 8>}, {pipeline_mode = #tpu.pipeline_mode<synchronous>, transform_indices = @transform_9, window_bounds = array<i64: 8, 1>}, {transform_indices = @transform_10, window_bounds = array<i64: 8, 256>}, {transform_indices = @transform_11, window_bounds = array<i64: 8, 256>}]} {
    %c0 = arith.constant 0 : index
    %c0_0 = arith.constant 0 : index
    %0 = vector.load %arg1[%c0, %c0_0] : memref<8x256xf32, #tpu.memory_space<vmem>>, vector<8x256xf32>
    %c0_1 = arith.constant 0 : index
    %c0_2 = arith.constant 0 : index
    %1 = vector.load %arg2[%c0_1, %c0_2] : memref<8x256xf32, #tpu.memory_space<vmem>>, vector<8x256xf32>
    %c0_3 = arith.constant 0 : index
    %c0_4 = arith.constant 0 : index
    %2 = vector.load %arg3[%c0_3, %c0_4] : memref<8x8xf32, #tpu.memory_space<vmem>>, vector<8x8xf32>
    %cst = arith.constant dense<0.000000e+00> : vector<8x256xf32>
    %3 = tpu.matmul %2, %0, %cst {dimension_numbers = #tpu.dot_dimension_numbers<[1], [0], [0], [1], [0, 0, 1, 1], [], []>} : vector<8x8xf32>, vector<8x256xf32>, vector<8x256xf32> -> vector<8x256xf32>
    %c0_5 = arith.constant 0 : index
    %c0_6 = arith.constant 0 : index
    %4 = vector.load %arg4[%c0_5, %c0_6] : memref<8x1xf32, #tpu.memory_space<vmem>>, vector<8x1xf32>
    %5 = vector.broadcast %4 : vector<8x1xf32> to vector<8x256xf32>
    %6 = arith.addf %3, %5 : vector<8x256xf32>
    %cst_7 = arith.constant 1.000000e-01 : f32
    %7 = vector.broadcast %cst_7 : f32 to vector<8x256xf32>
    %8 = arith.mulf %7, %6 : vector<8x256xf32>
    %9 = arith.maximumf %6, %8 : vector<8x256xf32>
    %c0_8 = arith.constant 0 : index
    %c0_9 = arith.constant 0 : index
    %10 = vector.load %arg5[%c0_8, %c0_9] : memref<8x8xf32, #tpu.memory_space<vmem>>, vector<8x8xf32>
    %cst_10 = arith.constant dense<0.000000e+00> : vector<8x256xf32>
    %11 = tpu.matmul %10, %9, %cst_10 {dimension_numbers = #tpu.dot_dimension_numbers<[1], [0], [0], [1], [0, 0, 1, 1], [], []>} : vector<8x8xf32>, vector<8x256xf32>, vector<8x256xf32> -> vector<8x256xf32>
    %c0_11 = arith.constant 0 : index
    %c0_12 = arith.constant 0 : index
    %12 = vector.load %arg6[%c0_11, %c0_12] : memref<8x1xf32, #tpu.memory_space<vmem>>, vector<8x1xf32>
    %13 = vector.broadcast %12 : vector<8x1xf32> to vector<8x256xf32>
    %14 = arith.addf %11, %13 : vector<8x256xf32>
    %c0_13 = arith.constant 0 : index
    %c0_14 = arith.constant 0 : index
    %15 = vector.load %arg7[%c0_13, %c0_14] : memref<8x8xf32, #tpu.memory_space<vmem>>, vector<8x8xf32>
    %cst_15 = arith.constant dense<0.000000e+00> : vector<8x256xf32>
    %16 = tpu.matmul %15, %1, %cst_15 {dimension_numbers = #tpu.dot_dimension_numbers<[1], [0], [0], [1], [0, 0, 1, 1], [], []>} : vector<8x8xf32>, vector<8x256xf32>, vector<8x256xf32> -> vector<8x256xf32>
    %c0_16 = arith.constant 0 : index
    %c0_17 = arith.constant 0 : index
    %17 = vector.load %arg8[%c0_16, %c0_17] : memref<8x1xf32, #tpu.memory_space<vmem>>, vector<8x1xf32>
    %18 = vector.broadcast %17 : vector<8x1xf32> to vector<8x256xf32>
    %19 = arith.addf %16, %18 : vector<8x256xf32>
    %cst_18 = arith.constant 1.000000e-01 : f32
    %20 = vector.broadcast %cst_18 : f32 to vector<8x256xf32>
    %21 = arith.mulf %20, %19 : vector<8x256xf32>
    %22 = arith.maximumf %19, %21 : vector<8x256xf32>
    %c0_19 = arith.constant 0 : index
    %c0_20 = arith.constant 0 : index
    %23 = vector.load %arg9[%c0_19, %c0_20] : memref<8x8xf32, #tpu.memory_space<vmem>>, vector<8x8xf32>
    %cst_21 = arith.constant dense<0.000000e+00> : vector<8x256xf32>
    %24 = tpu.matmul %23, %22, %cst_21 {dimension_numbers = #tpu.dot_dimension_numbers<[1], [0], [0], [1], [0, 0, 1, 1], [], []>} : vector<8x8xf32>, vector<8x256xf32>, vector<8x256xf32> -> vector<8x256xf32>
    %c0_22 = arith.constant 0 : index
    %c0_23 = arith.constant 0 : index
    %25 = vector.load %arg10[%c0_22, %c0_23] : memref<8x1xf32, #tpu.memory_space<vmem>>, vector<8x1xf32>
    %26 = vector.broadcast %25 : vector<8x1xf32> to vector<8x256xf32>
    %27 = arith.addf %24, %26 : vector<8x256xf32>
    %28 = math.cos %27 : vector<8x256xf32>
    %29 = arith.mulf %14, %28 : vector<8x256xf32>
    %c0_24 = arith.constant 0 : index
    %c0_25 = arith.constant 0 : index
    %30 = vector.load %arg11[%c0_24, %c0_25] : memref<8x256xf32, #tpu.memory_space<vmem>>, vector<8x256xf32>
    tpu.vector_store %arg11[%c0_24, %c0_25], %29 {strides = array<i32>} : memref<8x256xf32, #tpu.memory_space<vmem>>, vector<8x256xf32>,
    %31 = math.sin %27 : vector<8x256xf32>
    %32 = arith.mulf %14, %31 : vector<8x256xf32>
    %c0_26 = arith.constant 0 : index
    %c0_27 = arith.constant 0 : index
    %33 = vector.load %arg12[%c0_26, %c0_27] : memref<8x256xf32, #tpu.memory_space<vmem>>, vector<8x256xf32>
    tpu.vector_store %arg12[%c0_26, %c0_27], %32 {strides = array<i32>} : memref<8x256xf32, #tpu.memory_space<vmem>>, vector<8x256xf32>,
    return
  }
  func.func @transform_0(%arg0: i32) -> (i32, i32) {
    %c0_i32 = arith.constant 0 : i32
    %c0_i32_0 = arith.constant 0 : i32
    return %c0_i32, %arg0 : i32, i32
  }
  func.func @transform_1(%arg0: i32) -> (i32, i32) {
    %c0_i32 = arith.constant 0 : i32
    %c0_i32_0 = arith.constant 0 : i32
    return %c0_i32, %arg0 : i32, i32
  }
  func.func @transform_2(%arg0: i32) -> (i32, i32) {
    %c0_i32 = arith.constant 0 : i32
    %c0_i32_0 = arith.constant 0 : i32
    %c0_i32_1 = arith.constant 0 : i32
    return %c0_i32, %c0_i32_0 : i32, i32
  }
  func.func @transform_3(%arg0: i32) -> (i32, i32) {
    %c0_i32 = arith.constant 0 : i32
    %c0_i32_0 = arith.constant 0 : i32
    %c0_i32_1 = arith.constant 0 : i32
    return %c0_i32, %c0_i32_0 : i32, i32
  }
  func.func @transform_4(%arg0: i32) -> (i32, i32) {
    %c0_i32 = arith.constant 0 : i32
    %c0_i32_0 = arith.constant 0 : i32
    %c0_i32_1 = arith.constant 0 : i32
    return %c0_i32, %c0_i32_0 : i32, i32
  }
  func.func @transform_5(%arg0: i32) -> (i32, i32) {
    %c0_i32 = arith.constant 0 : i32
    %c0_i32_0 = arith.constant 0 : i32
    %c0_i32_1 = arith.constant 0 : i32
    return %c0_i32, %c0_i32_0 : i32, i32
  }
  func.func @transform_6(%arg0: i32) -> (i32, i32) {
    %c0_i32 = arith.constant 0 : i32
    %c0_i32_0 = arith.constant 0 : i32
    %c0_i32_1 = arith.constant 0 : i32
    return %c0_i32, %c0_i32_0 : i32, i32
  }
  func.func @transform_7(%arg0: i32) -> (i32, i32) {
    %c0_i32 = arith.constant 0 : i32
    %c0_i32_0 = arith.constant 0 : i32
    %c0_i32_1 = arith.constant 0 : i32
    return %c0_i32, %c0_i32_0 : i32, i32
  }
  func.func @transform_8(%arg0: i32) -> (i32, i32) {
    %c0_i32 = arith.constant 0 : i32
    %c0_i32_0 = arith.constant 0 : i32
    %c0_i32_1 = arith.constant 0 : i32
    return %c0_i32, %c0_i32_0 : i32, i32
  }
  func.func @transform_9(%arg0: i32) -> (i32, i32) {
    %c0_i32 = arith.constant 0 : i32
    %c0_i32_0 = arith.constant 0 : i32
    %c0_i32_1 = arith.constant 0 : i32
    return %c0_i32, %c0_i32_0 : i32, i32
  }
  func.func @transform_10(%arg0: i32) -> (i32, i32) {
    %c0_i32 = arith.constant 0 : i32
    %c0_i32_0 = arith.constant 0 : i32
    return %c0_i32, %arg0 : i32, i32
  }
  func.func @transform_11(%arg0: i32) -> (i32, i32) {
    %c0_i32 = arith.constant 0 : i32
    %c0_i32_0 = arith.constant 0 : i32
    return %c0_i32, %arg0 : i32, i32
  }
}

module attributes {stable_mosaic.version = 11 : i64} {
  func.func @_post_kernel(%arg0: i32, %arg1: memref<8x256xf32, #tpu.memory_space<vmem>>, %arg2: memref<8x8xf32, #tpu.memory_space<vmem>>, %arg3: memref<8x1xf32, #tpu.memory_space<vmem>>, %arg4: memref<8x256xf32, #tpu.memory_space<vmem>>) attributes {dimension_semantics = [#tpu.dimension_semantics<parallel>], iteration_bounds = array<i64: 1>, scalar_prefetch = 0 : i64, scratch_operands = 0 : i64, tpu.core_type = #tpu.core_type<tc>, window_params = [{transform_indices = @transform_0, window_bounds = array<i64: 8, 256>}, {pipeline_mode = #tpu.pipeline_mode<synchronous>, transform_indices = @transform_1, window_bounds = array<i64: 8, 8>}, {pipeline_mode = #tpu.pipeline_mode<synchronous>, transform_indices = @transform_2, window_bounds = array<i64: 8, 1>}, {transform_indices = @transform_3, window_bounds = array<i64: 8, 256>}]} {
    %c0 = arith.constant 0 : index
    %c0_0 = arith.constant 0 : index
    %0 = vector.load %arg2[%c0, %c0_0] : memref<8x8xf32, #tpu.memory_space<vmem>>, vector<8x8xf32>
    %c0_1 = arith.constant 0 : index
    %c0_2 = arith.constant 0 : index
    %1 = vector.load %arg1[%c0_1, %c0_2] : memref<8x256xf32, #tpu.memory_space<vmem>>, vector<8x256xf32>
    %cst = arith.constant dense<0.000000e+00> : vector<8x256xf32>
    %2 = tpu.matmul %0, %1, %cst {dimension_numbers = #tpu.dot_dimension_numbers<[1], [0], [0], [1], [0, 0, 1, 1], [], []>} : vector<8x8xf32>, vector<8x256xf32>, vector<8x256xf32> -> vector<8x256xf32>
    %c0_3 = arith.constant 0 : index
    %c0_4 = arith.constant 0 : index
    %3 = vector.load %arg3[%c0_3, %c0_4] : memref<8x1xf32, #tpu.memory_space<vmem>>, vector<8x1xf32>
    %4 = vector.broadcast %3 : vector<8x1xf32> to vector<8x256xf32>
    %5 = arith.addf %2, %4 : vector<8x256xf32>
    %c0_5 = arith.constant 0 : index
    %c0_6 = arith.constant 0 : index
    %6 = vector.load %arg4[%c0_5, %c0_6] : memref<8x256xf32, #tpu.memory_space<vmem>>, vector<8x256xf32>
    tpu.vector_store %arg4[%c0_5, %c0_6], %5 {strides = array<i32>} : memref<8x256xf32, #tpu.memory_space<vmem>>, vector<8x256xf32>,
    return
  }
  func.func @transform_0(%arg0: i32) -> (i32, i32) {
    %c0_i32 = arith.constant 0 : i32
    %c0_i32_0 = arith.constant 0 : i32
    return %c0_i32, %arg0 : i32, i32
  }
  func.func @transform_1(%arg0: i32) -> (i32, i32) {
    %c0_i32 = arith.constant 0 : i32
    %c0_i32_0 = arith.constant 0 : i32
    %c0_i32_1 = arith.constant 0 : i32
    return %c0_i32, %c0_i32_0 : i32, i32
  }
  func.func @transform_2(%arg0: i32) -> (i32, i32) {
    %c0_i32 = arith.constant 0 : i32
    %c0_i32_0 = arith.constant 0 : i32
    %c0_i32_1 = arith.constant 0 : i32
    return %c0_i32, %c0_i32_0 : i32, i32
  }
  func.func @transform_3(%arg0: i32) -> (i32, i32) {
    %c0_i32 = arith.constant 0 : i32
    %c0_i32_0 = arith.constant 0 : i32
    return %c0_i32, %arg0 : i32, i32
  }
}

</mosaic_0001>

<bundles_post_ra>
// kernel: freup_areadinterpolation.2
= control target key start
LH: loop header
LB: loop body
LE: loop exit
PB: predicated region body
PF: predicated region fallthrough
CT: control target
= control target key end

     0   :  { %v850_v2 = vmov 0.0   ;;  %vm48_vm0 = vcmask 64512   ;;  %v851_v4 = vmov 0   ;;  %v852_v57 = vmov 683565275   ;;  %s1045_s0 = inlined_call_operand.vmem [shape: f32[8,256], index: 0, kind: input, shape index: {}]   ;;  %s1046_s2 = inlined_call_operand.vmem [shape: f32[8,8], index: 2, kind: input, shape index: {}]   ;;  %s1047_s1 = inlined_call_operand.vmem [shape: f32[8,256], index: 1, kind: input, shape index: {}]   ;;  %s1048_s3 = inlined_call_operand.vmem [shape: f32[8,1], index: 3, kind: input, shape index: {}]   ;;  %s1049_s6 = inlined_call_operand.vmem [shape: f32[8,8], index: 6, kind: input, shape index: {}]   ;;  %s1050_s7 = inlined_call_operand.vmem [shape: f32[8,1], index: 7, kind: input, shape index: {}]   ;;  %s1051_s9 = inlined_call_operand.vmem [shape: f32[8,1], index: 9, kind: input, shape index: {}]   ;;  %s1052_s5 = inlined_call_operand.vmem [shape: f32[8,1], index: 5, kind: input, shape index: {}]   ;;  %s1053_s4 = inlined_call_operand.vmem [shape: f32[8,8], index: 4, kind: input, shape index: {}]   ;;  %s1054_s8 = inlined_call_operand.vmem [shape: f32[8,8], index: 8, kind: input, shape index: {}]   ;;  %s1055_s10 = inlined_call_operand.vmem [shape: f32[8,256], index: 10, kind: output, shape index: {0}]   ;;  %s1056_s11 = inlined_call_operand.vmem [shape: f32[8,256], index: 11, kind: output, shape index: {1}]  }
   0x1   :  { %v38_v0 = vld [vmem:[%s1045_s0 + $0x8] sm:$0xff]  ;;  %v37_v1 = vld [vmem:[%s1045_s0] sm:$0xff]  ;;  %116 = vmatprep.mubr.f32.mxu0 %v850_v2  ;;  %840 = vset.pattern.permute.xlu0 %v851_v4  ;;  %v853_v60 = vmov 2475754826   ;;  %v854_v62 = vmov 2131351028  }
   0x2   :  { %v41_v3 = vld [vmem:[%s1046_s2] sm:$0xff]  ;;  %82 = vmatprep.subr.mxu0 %v38_v0  ;;  %v40_v5 = vld [vmem:[%s1047_s1 + $0x8] sm:$0xff]  ;;  %201 = vmatprep.mubr.f32.mxu1 %v850_v2  ;;  %v855_v0 = vmov 2102212464  }
   0x3   :  { %v39_v6 = vld [vmem:[%s1047_s1] sm:$0xff]  ;;  %83 = vmatpush1.msra.mxu0 %v37_v1  ;;  %841 = vset.pattern.permute.xlu1 %v851_v4 }
   0x4   :  { %v42_v7 = vld [vmem:[%s1048_s3] sm:$0xff]  ;;  %804 = vmatmul.mubr.msk.f32.vlgmr.msra.gmra.mxu0 %vm48_vm0, %v41_v3  ;;  %248 = vmatprep.subr.mxu0 %v40_v5 }
   0x5   :  { %249 = vmatpush1.msra.mxu0 %v39_v6  ;;  %282 = vmatprep.mubr.f32.mxu0 %v850_v2  ;;  %v208_v8 = vld [vmem:[%s1049_s6] sm:$0xff] }
   0x6   :  { %45 = vperm.xlu0 %840, %v42_v7   ;;  %v209_v9 = vld [vmem:[%s1050_s7] sm:$0xff] }
   0x7   :  { %v294_v10 = vld [vmem:[%s1051_s9] sm:$0xff] }
   0x8   :  { %806 = vmatmul.mubr.msk.f32.vlgmr.msra.gmra.mxu0 %vm48_vm0, %v208_v8  ;;  %297 = vperm.xlu1 %841, %v294_v10   ;;  %v128_v11 = vld [vmem:[%s1052_s5] sm:$0xff] }
   0x9   :  { %v127_v27 = vld [vmem:[%s1053_s4] sm:$0xff] }
   0xa   :  { %212 = vperm.xlu0 %840, %v209_v9   ;;  %v293_v31 = vld [vmem:[%s1054_s8] sm:$0xff]  ;;  %v857_v9 = vmov 1326507024  }
   0xc   :  { %131 = vperm.xlu1 %841, %v128_v11  }
  0x81   :  { %v46_v12 = vpop.permute.xlu0 %45 }
  0x83   :  { %v298_v34 = vpop.permute.xlu1 %297 }
  0x85   :  { %v213_v18 = vpop.permute.xlu0 %212 }
  0xc4   :  { %v118_v13 = vpop.f32.mrf.mxu0 }
  0xc5   :  { %v119_v14 = vadd.f32 %v118_v13, %v46_v12 }
  0xc6   :  { %v120_v15 = vpop.f32.mrf.mxu0 }
  0xc7   :  { %v121_v16 = vadd.f32 %v120_v15, %v46_v12  ;;  %v123_v17 = vmul.f32 0.1, %v119_v14 }
  0xc8   :  { %v284_v19 = vpop.f32.mrf.mxu0 }
  0xc9   :  { %v285_v20 = vadd.f32 %v284_v19, %v213_v18  ;;  %v124_v21 = vmul.f32 0.1, %v121_v16  ;;  %v125_v26 = vmax.f32 %v119_v14, %v123_v17 }
  0xca   :  { %v286_v22 = vpop.f32.mrf.mxu0 }
  0xcb   :  { %v287_v23 = vadd.f32 %v286_v22, %v213_v18  ;;  %v126_v24 = vmax.f32 %v121_v16, %v124_v21  ;;  %v289_v25 = vmul.f32 0.1, %v285_v20 }
  0xcd   :  { %v290_v28 = vmul.f32 0.1, %v287_v23  ;;  %167 = vmatprep.subr.mxu1 %v126_v24  ;;  %v291_v30 = vmax.f32 %v285_v20, %v289_v25 }
  0xce   :  { %168 = vmatpush1.msra.mxu1 %v125_v26 }
  0xcf   :  { %v292_v29 = vmax.f32 %v287_v23, %v290_v28  ;;  %805 = vmatmul.mubr.msk.f32.vlgmr.msra.gmra.mxu1 %vm48_vm0, %v127_v27 }
  0xd0   :  { %367 = vmatprep.mubr.f32.mxu1 %v850_v2  ;;  %v856_v2 = vmov 920167782  }
  0xd1   :  { %333 = vmatprep.subr.mxu1 %v292_v29 }
  0xd2   :  { %334 = vmatpush1.msra.mxu1 %v291_v30 }
  0xd3   :  { %807 = vmatmul.mubr.msk.f32.vlgmr.msra.gmra.mxu1 %vm48_vm0, %v293_v31 }
 0x18f   :  { %v958_v32 = vpop.f32.mrf.mxu1 }
 0x191   :  { %v960_v33 = vpop.f32.mrf.mxu1 }
 0x193   :  { %v369_v35 = vpop.f32.mrf.mxu1 }
 0x194   :  { %v962_v36 = vadd.f32 %v369_v35, %v298_v34 }
 0x195   :  { %v371_v37 = vpop.f32.mrf.mxu1 }
 0x196   :  { %v374_v38 = vand.u32 2147483647, %v962_v36  ;;  %v377_v39 = vand.u32 2139095040, %v962_v36  ;;  %v966_v40 = vadd.f32 %v371_v37, %v298_v34  ;;  %vm376_vm15 = vcmp.lt.s32.totalorder %v962_v36, 0 }
 0x198   :  { %v378_v41 = vshrl.u32 %v377_v39, 23  ;;  %v381_v42 = vand.u32 8388607, %v374_v38  ;;  %v480_v43 = vand.u32 2139095040, %v966_v40  ;;  %v477_v45 = vand.u32 2147483647, %v966_v40 }
 0x199   :  { %vm375_vm0 = vcmp.le.f32.partialorder %v374_v38, 0.7853982 }
 0x19a   :  { %v808_v44 = vadd.s32 4294967169, %v378_v41  ;;  %v481_v46 = vshrl.u32 %v480_v43, 23  ;;  %v382_v48 = vor.u32 8388608, %v381_v42  ;;  %v484_v50 = vand.u32 8388607, %v477_v45 }
 0x19c   :  { %v384_v47 = vadd.s32 1, %v808_v44  ;;  %v812_v49 = vadd.s32 4294967169, %v481_v46  ;;  %v974_v55 = vshll.u32 %v382_v48, 8  ;;  %v485_v59 = vor.u32 8388608, %v484_v50 }
 0x19e   :  { %vm385_vm1 = vcmp.gt.s32.totalorder %v384_v47, 0  ;;  %v487_v52 = vadd.s32 1, %v812_v49  ;;  %v525_v28 = vshll.u32 %v485_v59, 8 }
 0x19f   :  { %v386_v51 = vsel %vm385_vm1, %v384_v47, 0  ;;  %vm479_vm1 = vcmp.lt.s32.totalorder %v966_v40, 0 }
 0x1a0   :  { %v387_v53 = vshrl.u32 %v386_v51, 5  ;;  %v388_v54 = vand.u32 31, %v386_v51  ;;  %vm488_vm2 = vcmp.gt.s32.totalorder %v487_v52, 0 }
 0x1a1   :  { %v489_v14 = vsel %vm488_vm2, %v487_v52, 0  ;;  %vm1020_vm2 = vcmp.le.f32.partialorder %v477_v45, 0.7853982 }
 0x1a2   :  { %v389_v56 = vsub.s32 32, %v388_v54  ;;  %v391_v58 = vshll.u32 %v852_v57, %v388_v54  ;;  %v394_v61 = vshll.u32 %v853_v60, %v388_v54  ;;  %v397_v63 = vshll.u32 %v854_v62, %v388_v54 }
 0x1a3   :  { %v400_v1 = vshll.u32 %v855_v0, %v388_v54  ;;  %v403_v3 = vshll.u32 %v856_v2, %v388_v54  ;;  %vm406_vm3 = vcmp.lt.s32.totalorder %v387_v53, 1  ;;  %vm408_vm4 = vcmp.lt.s32.totalorder %v387_v53, 3 }
 0x1a4   :  { %v392_v4 = vshrl.u32 %v853_v60, %v389_v56  ;;  %v395_v5 = vshrl.u32 %v854_v62, %v389_v56  ;;  %v398_v6 = vshrl.u32 %v855_v0, %v389_v56  ;;  %v390_v7 = vshrl.u32 %v852_v57, %v389_v56 }
 0x1a5   :  { %v401_v8 = vshrl.u32 %v856_v2, %v389_v56  ;;  %v404_v10 = vshrl.u32 %v857_v9, %v389_v56  ;;  %vm409_vm5 = vcmp.lt.s32.totalorder %v387_v53, 4  ;;  %v491_v17 = vand.u32 31, %v489_v14 }
 0x1a6   :  { %v393_v11 = vor.u32 %v392_v4, %v391_v58  ;;  %v396_v12 = vor.u32 %v395_v5, %v394_v61  ;;  %v399_v13 = vor.u32 %v398_v6, %v397_v63  ;;  %vm407_vm6 = vcmp.lt.s32.totalorder %v387_v53, 2 }
 0x1a7   :  { %v402_v15 = vor.u32 %v401_v8, %v400_v1  ;;  %v405_v16 = vor.u32 %v404_v10, %v403_v3  ;;  %v492_v25 = vsub.s32 32, %v491_v17  ;;  %v490_v34 = vshrl.u32 %v489_v14, 5 }
 0x1a8   :  { %v410_v18 = vsel %vm406_vm3, %v390_v7, %v393_v11  ;;  %v411_v19 = vsel %vm409_vm5, %v399_v13, 2102212464  ;;  %v414_v20 = vsel %vm406_vm3, %v393_v11, %v396_v12  ;;  %v418_v21 = vsel %vm406_vm3, %v396_v12, %v399_v13 }
 0x1a9   :  { %v412_v22 = vsel %vm408_vm4, %v396_v12, %v411_v19  ;;  %v415_v23 = vsel %vm409_vm5, %v402_v15, 920167782  ;;  %v419_v24 = vsel %vm409_vm5, %v405_v16, 1326507024  ;;  %v494_v42 = vshll.u32 %v852_v57, %v491_v17 }
 0x1aa   :  { %v416_v26 = vsel %vm408_vm4, %v399_v13, %v415_v23  ;;  %v420_v27 = vsel %vm408_vm4, %v402_v15, %v419_v24  ;;  %v413_v29 = vsel %vm407_vm6, %v410_v18, %v412_v22  ;;  %v495_v43 = vshrl.u32 %v853_v60, %v492_v25 }
 0x1ab   :  { %v417_v30 = vsel %vm407_vm6, %v414_v20, %v416_v26  ;;  %v421_v31 = vsel %vm407_vm6, %v418_v21, %v420_v27  ;;  %v497_v44 = vshll.u32 %v853_v60, %v491_v17  ;;  %v498_v46 = vshrl.u32 %v854_v62, %v492_v25 }
 0x1ac   :  { %v986_v35 = vmul.u32.u64.low %v974_v55, %v421_v31  ;;  %v987_v37 = vmul.u32.u64.high %v974_v55, %v421_v31, %v986_v35  ;;  %v990_v39 = vmul.u32.u64.low %v974_v55, %v417_v30  ;;  %v991_v41 = vmul.u32.u64.high %v974_v55, %v417_v30, %v990_v39 }
 0x1ad   :  { %v500_v47 = vshll.u32 %v854_v62, %v491_v17  ;;  %v501_v48 = vshrl.u32 %v855_v0, %v492_v25  ;;  %v503_v49 = vshll.u32 %v855_v0, %v491_v17  ;;  %v504_v50 = vshrl.u32 %v856_v2, %v492_v25 }
 0x1ae   :  { %v496_v51 = vor.u32 %v495_v43, %v494_v42  ;;  %v499_v52 = vor.u32 %v498_v46, %v497_v44  ;;  %v506_v53 = vshll.u32 %v856_v2, %v491_v17  ;;  %v507_v54 = vshrl.u32 %v857_v9, %v492_v25 }
 0x1af   :  { %v429_v56 = vmul.u32 %v974_v55, %v413_v29  ;;  %vm431_vm7 = vc.u32 %v987_v37, %v990_v39  ;;  %v432_v58 = vadd.s32 1, %v991_v41  ;;  %v502_v59 = vor.u32 %v501_v48, %v500_v47 }
 0x1b0   :  { %v493_v61 = vshrl.u32 %v852_v57, %v492_v25  ;;  %v505_v60 = vor.u32 %v504_v50, %v503_v49  ;;  %v508_v63 = vor.u32 %v507_v54, %v506_v53  ;;  %vm509_vm8 = vcmp.lt.s32.totalorder %v490_v34, 1 }
 0x1b1   :  { %v433_v62 = vsel %vm431_vm7, %v432_v58, %v991_v41  ;;  %vm511_vm9 = vcmp.lt.s32.totalorder %v490_v34, 3  ;;  %vm512_vm10 = vcmp.lt.s32.totalorder %v490_v34, 4  ;;  %v517_v0 = vsel %vm509_vm8, %v496_v51, %v499_v52 }
 0x1b2   :  { %v434_v1 = vadd.s32 %v433_v62, %v429_v56  ;;  %v514_v2 = vsel %vm512_vm10, %v502_v59, 2102212464  ;;  %v518_v3 = vsel %vm512_vm10, %v505_v60, 920167782  ;;  %v521_v55 = vsel %vm509_vm8, %v499_v52, %v502_v59 }
 0x1b3   :  { %vm510_vm11 = vcmp.lt.s32.totalorder %v490_v34, 2  ;;  %v513_v4 = vsel %vm509_vm8, %v493_v61, %v496_v51  ;;  %v519_v5 = vsel %vm511_vm9, %v502_v59, %v518_v3  ;;  %v522_v6 = vsel %vm512_vm10, %v508_v63, 1326507024 }
 0x1b4   :  { %v435_v7 = vadd.s32 536870912, %v434_v1  ;;  %v515_v8 = vsel %vm511_vm9, %v499_v52, %v514_v2  ;;  %v520_v9 = vsel %vm510_vm11, %v517_v0, %v519_v5  ;;  %v523_v57 = vsel %vm511_vm9, %v505_v60, %v522_v6 }
 0x1b5   :  { %v524_v10 = vsel %vm510_vm11, %v521_v55, %v523_v57  ;;  %v1001_v11 = vmul.u32.u64.low %v525_v28, %v520_v9  ;;  %v1002_v12 = vmul.u32.u64.high %v525_v28, %v520_v9, %v1001_v11  ;;  %v516_v16 = vsel %vm510_vm11, %v513_v4, %v515_v8 }
 0x1b6   :  { %v436_v13 = vshrl.u32 %v435_v7, 30  ;;  %v1004_v14 = vmul.u32.u64.low %v525_v28, %v524_v10  ;;  %v1005_v15 = vmul.u32.u64.high %v525_v28, %v524_v10, %v1004_v14  ;;  %v532_v20 = vmul.u32 %v525_v28, %v516_v16 }
 0x1b7   :  { %v535_v18 = vadd.s32 1, %v1002_v12  ;;  %v430_v35 = vadd.s32 %v990_v39, %v987_v37  ;;  %v132_v14 = vpop.permute.xlu1 %131  ;;  %vm466_vm9 = vweird.f32 %v962_v36 }
 0x1b8   :  { %v437_v17 = vshll.u32 %v436_v13, 30  ;;  %vm534_vm12 = vc.u32 %v1005_v15, %v1001_v11  ;;  %v533_v59 = vadd.s32 %v1001_v11, %v1005_v15  ;;  %v460_v60 = vsub.s32 4, %v436_v13 }
 0x1b9   :  { %v536_v21 = vsel %vm534_vm12, %v535_v18, %v1002_v12 }
 0x1ba   :  { %v438_v19 = vsub.s32 %v434_v1, %v437_v17  ;;  %v537_v23 = vadd.s32 %v536_v21, %v532_v20  ;;  %v461_v4 = vsel %vm376_vm15, %v460_v60, %v436_v13  ;;  %v204_v20 = vadd.f32 %v958_v32, %v132_v14 }
 0x1bb   :  { %v463_v8 = vsel %vm375_vm0, 0, %v461_v4 }
 0x1bc   :  { %v440_v22 = vsub.s32 0, %v438_v19  ;;  %v538_v25 = vadd.s32 536870912, %v537_v23  ;;  %v677_v57 = vadd.s32 3, %v463_v8  ;;  %v467_v15 = vand.u32 3, %v463_v8 }
 0x1be   :  { %v809_v24 = vmin.u32 %v440_v22, %v438_v19  ;;  %v539_v27 = vshrl.u32 %v538_v25, 30  ;;  %v678_v16 = vand.u32 3, %v677_v57  ;;  %vm472_vm3 = vcmp.eq.s32.totalorder %v467_v15, 2 }
 0x1bf   :  { %vm469_vm5 = vcmp.eq.s32.totalorder %v467_v15, 0  ;;  %vm468_vm7 = vcmp.lt.s32.totalorder %v467_v15, 2 }
 0x1c0   :  { %v442_v26 = vclz %v809_v24  ;;  %v540_v30 = vshll.u32 %v539_v27, 30  ;;  %v563_v11 = vsub.s32 4, %v539_v27  ;;  %vm683_vm4 = vcmp.eq.s32.totalorder %v678_v16, 2 }
 0x1c1   :  { %vm680_vm6 = vcmp.eq.s32.totalorder %v678_v16, 0  ;;  %vm679_vm8 = vcmp.lt.s32.totalorder %v678_v16, 2 }
 0x1c2   :  { %v810_v29 = vadd.s32 4294967294, %v442_v26  ;;  %v541_v34 = vsub.s32 %v537_v23, %v540_v30  ;;  %v564_v17 = vsel %vm479_vm1, %v563_v11, %v539_v27 }
 0x1c3   :  { %v566_v22 = vsel %vm1020_vm2, 0, %v564_v17 }
 0x1c4   :  { %vm811_vm13 = vcmp.lt.s32.totalorder %v810_v29, 0  ;;  %v543_v42 = vsub.s32 0, %v541_v34  ;;  %v781_v32 = vadd.s32 3, %v566_v22 }
 0x1c5   :  { %v445_v31 = vsel %vm811_vm13, 0, %v810_v29 }
 0x1c6   :  { %v446_v41 = vsub.s32 32, %v445_v31  ;;  %v450_v28 = vsub.s32 4294967266, %v445_v31  ;;  %v447_v43 = vshll.u32 %v438_v19, %v445_v31  ;;  %v813_v47 = vmin.u32 %v543_v42, %v541_v34 }
 0x1c8   :  { %v448_v44 = vshrl.u32 %v430_v35, %v446_v41  ;;  %v451_v46 = vadd.s32 127, %v450_v28  ;;  %v545_v50 = vclz %v813_v47  ;;  %v570_v41 = vand.u32 3, %v566_v22 }
 0x1c9   :  { %v782_v28 = vand.u32 3, %v781_v32 }
 0x1ca   :  { %v449_v48 = vor.u32 %v448_v44, %v447_v43  ;;  %v452_v49 = vshll.u32 %v451_v46, 23  ;;  %v814_v52 = vadd.s32 4294967294, %v545_v50  ;;  %vm575_vm10 = vcmp.eq.s32.totalorder %v570_v41, 2 }
 0x1cb   :  { %vm787_vm11 = vcmp.eq.s32.totalorder %v782_v28, 2  ;;  %vm572_vm12 = vcmp.eq.s32.totalorder %v570_v41, 0  ;;  %vm784_vm13 = vcmp.eq.s32.totalorder %v782_v28, 0  ;;  %v206_v50 = vadd.f32 %v960_v33, %v132_v14 }
 0x1cc   :  { %v453_v51 = vor.u32 4788187, %v452_v49  ;;  %v456_v54 = vcvt.s32.f32 %v449_v48  ;;  %vm815_vm14 = vcmp.lt.s32.totalorder %v814_v52, 0 }
 0x1cd   :  { %v548_v58 = vsel %vm815_vm14, 0, %v814_v52  ;;  %vm571_vm14 = vcmp.lt.s32.totalorder %v570_v41, 2 }
 0x1ce   :  { %v454_v53 = vand.u32 2147483647, %v453_v51  ;;  %v549_v37 = vsub.s32 32, %v548_v58  ;;  %v553_v39 = vsub.s32 4294967266, %v548_v58  ;;  %v550_v63 = vshll.u32 %v541_v34, %v548_v58 }
 0x1d0   :  { %v457_v56 = vmul.f32 %v456_v54, %v454_v53  ;;  %v551_v62 = vshrl.u32 %v533_v59, %v549_v37  ;;  %v554_v0 = vadd.s32 127, %v553_v39 }
 0x1d2   :  { %v458_v61 = vxor.u32 2147483648, %v457_v56  ;;  %v552_v3 = vor.u32 %v551_v62, %v550_v63  ;;  %v555_v55 = vshll.u32 %v554_v0, 23 }
 0x1d4   :  { %v459_v1 = vsel %vm376_vm15, %v458_v61, %v457_v56  ;;  %v556_v5 = vor.u32 4788187, %v555_v55  ;;  %v559_v7 = vcvt.s32.f32 %v552_v3  ;;  %vm783_vm15 = vcmp.lt.s32.totalorder %v782_v28, 2 }
 0x1d5   :  { %v462_v2 = vsel %vm375_vm0, %v962_v36, %v459_v1  ;;  %vm569_vm0 = vweird.f32 %v966_v40 }
 0x1d6   :  { %842 = vcosq.f32 %v462_v2  ;;  %v557_v6 = vand.u32 2147483647, %v556_v5 }
 0x1d7   :  { %844 = vsinq.f32 %v462_v2 }
 0x1d8   :  { %v560_v9 = vmul.f32 %v559_v7, %v557_v6 }
 0x1da   :  { %v561_v10 = vxor.u32 2147483648, %v560_v9 }
 0x1dc   :  { %v562_v12 = vsel %vm479_vm1, %v561_v10, %v560_v9 }
 0x1dd   :  { %v565_v13 = vsel %vm1020_vm2, %v966_v40, %v562_v12 }
 0x1de   :  { %846 = vcosq.f32 %v565_v13 }
 0x1df   :  { %848 = vsinq.f32 %v565_v13 }
 0x1e3   :  { %v843_v18 = vpop.eup %842 }
 0x1e4   :  { %v845_v19 = vpop.eup %844  ;;  %v473_v21 = vxor.u32 2147483648, %v843_v18 }
 0x1e5   :  { %v470_v45 = vxor.u32 2147483648, %v845_v19 }
 0x1e6   :  { %v474_v23 = vsel %vm472_vm3, %v473_v21, %v845_v19  ;;  %v685_v24 = vsel %vm683_vm4, %v473_v21, %v845_v19 }
 0x1e7   :  { %v471_v25 = vsel %vm469_vm5, %v843_v18, %v470_v45  ;;  %v682_v26 = vsel %vm680_vm6, %v843_v18, %v470_v45 }
 0x1e8   :  { %v475_v27 = vsel %vm468_vm7, %v471_v25, %v474_v23  ;;  %v686_v29 = vsel %vm679_vm8, %v682_v26, %v685_v24 }
 0x1e9   :  { %v476_v30 = vsel %vm466_vm9, nan, %v475_v27  ;;  %v687_v31 = vsel %vm466_vm9, nan, %v686_v29 }
 0x1ea   :  { %v580_v34 = vmul.f32 %v476_v30, %v204_v20  ;;  %v792_v35 = vmul.f32 %v687_v31, %v204_v20 }
 0x1eb   :  { %v847_v42 = vpop.eup %846 }
 0x1ec   :  { %582 = vst [vmem:[%s1055_s10] sm:$0xff] %v580_v34  ;;  %794 = vst [vmem:[%s1056_s11] sm:$0xff] %v792_v35  ;;  %v849_v43 = vpop.eup %848  ;;  %v576_v36 = vxor.u32 2147483648, %v847_v42 }
 0x1ed   :  { %v573_v44 = vxor.u32 2147483648, %v849_v43 }
 0x1ee   :  { %v577_v46 = vsel %vm575_vm10, %v576_v36, %v849_v43  ;;  %v789_v47 = vsel %vm787_vm11, %v576_v36, %v849_v43 }
 0x1ef   :  { %v574_v48 = vsel %vm572_vm12, %v847_v42, %v573_v44  ;;  %v786_v49 = vsel %vm784_vm13, %v847_v42, %v573_v44 }
 0x1f0   :  { %v578_v51 = vsel %vm571_vm14, %v574_v48, %v577_v46  ;;  %v790_v52 = vsel %vm783_vm15, %v786_v49, %v789_v47 }
 0x1f1   :  { %v579_v53 = vsel %vm569_vm0, nan, %v578_v51  ;;  %v791_v54 = vsel %vm569_vm0, nan, %v790_v52 }
 0x1f2   :  { %v581_v56 = vmul.f32 %v579_v53, %v206_v50  ;;  %v793_v58 = vmul.f32 %v791_v54, %v206_v50 }
 0x1f4   :  { %583 = vst [vmem:[%s1055_s10 + $0x8] sm:$0xff] %v581_v56  ;;  %795 = vst [vmem:[%s1056_s11 + $0x8] sm:$0xff] %v793_v58 }

// kernel: freup_areadinterpolation.3
= control target key start
LH: loop header
LB: loop body
LE: loop exit
PB: predicated region body
PF: predicated region fallthrough
CT: control target
= control target key end

     0   :  { %v108_v2 = vmov 0.0   ;;  %vm23_vm0 = vcmask 64512   ;;  %v109_v4 = vmov 0   ;;  %s148_s0 = inlined_call_operand.vmem [shape: f32[8,256], index: 0, kind: input, shape index: {}]   ;;  %s149_s1 = inlined_call_operand.vmem [shape: f32[8,8], index: 1, kind: input, shape index: {}]   ;;  %s150_s2 = inlined_call_operand.vmem [shape: f32[8,1], index: 2, kind: input, shape index: {}]   ;;  %s151_s3 = inlined_call_operand.vmem [shape: f32[8,256], index: 3, kind: output, shape index: {}]  }
   0x1   :  { %v16_v0 = vld [vmem:[%s148_s0 + $0x8] sm:$0xff]  ;;  %v15_v1 = vld [vmem:[%s148_s0] sm:$0xff]  ;;  %91 = vmatprep.mubr.f32.mxu0 %v108_v2  ;;  %107 = vset.pattern.permute.xlu0 %v109_v4 }
   0x2   :  { %v14_v3 = vld [vmem:[%s149_s1] sm:$0xff]  ;;  %57 = vmatprep.subr.mxu0 %v16_v0 }
   0x3   :  { %v17_v5 = vld [vmem:[%s150_s2] sm:$0xff]  ;;  %58 = vmatpush1.msra.mxu0 %v15_v1 }
   0x4   :  { %20 = vperm.xlu0 %107, %v17_v5   ;;  %104 = vmatmul.mubr.msk.f32.vlgmr.msra.gmra.mxu0 %vm23_vm0, %v14_v3 }
  0x7f   :  { %v21_v6 = vpop.permute.xlu0 %20 }
  0xc4   :  { %v93_v7 = vpop.f32.mrf.mxu0 }
  0xc5   :  { %v94_v8 = vadd.f32 %v93_v7, %v21_v6 }
  0xc6   :  { %v95_v9 = vpop.f32.mrf.mxu0 }
  0xc7   :  { %98 = vst [vmem:[%s151_s3] sm:$0xff] %v94_v8  ;;  %v96_v10 = vadd.f32 %v95_v9, %v21_v6 }
  0xc9   :  { %99 = vst [vmem:[%s151_s3 + $0x8] sm:$0xff] %v96_v10 }

</bundles_post_ra>
